<compile_context>
chip_gen: v7x
topology: tpu7x:2x2x1
jax: 0.10.0
libtpu: 0.0.40
codegen_flags: <defaults>
</compile_context>

<pallas_src>
import jax
import jax.numpy as jnp
from jax.experimental import pallas as pl
from jax.experimental.pallas import tpu as pltpu

NUM_INPUTS = 4      # CartPole-v0 observation_space.shape[0]
HIDDEN = 64         # hidden_layer
NUM_OUTPUTS = 2     # CartPole-v0 action_space.n
MAX_TILE = 2048     # batch tile cap (rows), multiple of 8


def _cdiv(a, b):
    return (a + b - 1) // b


def _round_up(n, m):
    return ((n + m - 1) // m) * m


def _mlp_kernel(x_ref, w1_ref, b1_ref, w2_ref, b2_ref, o_ref):
    x = x_ref[...]                      # (TB, 4)   f32
    w1 = w1_ref[...]                    # (4, 64)   f32

    # ---- layer 1 on the VPU: unrolled K=4 broadcast-FMA (MXU not needed) ----
    h = x[:, 0:1] * w1[0:1, :]          # (TB, 1) * (1, 64) -> (TB, 64)
    for k in range(1, NUM_INPUTS):      # static unroll (NUM_INPUTS == 4)
        h = h + x[:, k:k + 1] * w1[k:k + 1, :]
    h = jnp.tanh(h + b1_ref[...])       # bias broadcast (1, 64); tanh on EUP

    # ---- layer 2: K=64, N=2 matmul; store only the 2 real output lanes ----
    out = jnp.dot(h, w2_ref[...], preferred_element_type=jnp.float32)  # (TB, 2)
    o_ref[...] = (out + b2_ref[...]).astype(o_ref.dtype)


def neural_network_forward(x, w1, b1, w2, b2):
    """x: (B, 4) f32 -> (B, 2) f32. Full forward inside one Pallas kernel."""
    B = x.shape[0]

    # Batch tile: multiple of 8 (sublane), capped at MAX_TILE, and chosen so
    # that batches with >16 rows produce at least 2 grid steps (v7x dual-TC).
    TB = min(MAX_TILE, max(8, _round_up(_cdiv(B, 2), 8)))
    grid = (_cdiv(B, TB),)              # ragged last block is fine (row-independent)

    b1_2d = b1.reshape(1, HIDDEN) if b1.ndim == 1 else b1
    b2_2d = b2.reshape(1, NUM_OUTPUTS) if b2.ndim == 1 else b2

    return pl.pallas_call(
        _mlp_kernel,
        out_shape=jax.ShapeDtypeStruct((B, NUM_OUTPUTS), jnp.float32),
        grid=grid,
        in_specs=[
            pl.BlockSpec((TB, NUM_INPUTS), lambda i: (i, 0)),        # x: tiled on batch
            pl.BlockSpec((NUM_INPUTS, HIDDEN), lambda i: (0, 0)),    # w1: VMEM-resident
            pl.BlockSpec((1, HIDDEN), lambda i: (0, 0)),             # b1: VMEM-resident
            pl.BlockSpec((HIDDEN, NUM_OUTPUTS), lambda i: (0, 0)),   # w2: VMEM-resident
            pl.BlockSpec((1, NUM_OUTPUTS), lambda i: (0, 0)),        # b2: VMEM-resident
        ],
        out_specs=pl.BlockSpec((TB, NUM_OUTPUTS), lambda i: (i, 0)),
        compiler_params=pltpu.CompilerParams(
            dimension_semantics=("parallel",)),   # shard batch tiles across TCs (v7x)
    )(x, w1, b1_2d, w2, b2_2d)


def init_params(key):
    """Deterministic init mirroring PyTorch nn.Linear default:
    uniform(-1/sqrt(fan_in), 1/sqrt(fan_in)) for both weight and bias."""
    k1, k2, k3, k4 = jax.random.split(key, 4)
    bound1 = 1.0 / jnp.sqrt(jnp.float32(NUM_INPUTS))
    bound2 = 1.0 / jnp.sqrt(jnp.float32(HIDDEN))
    # stored as (in, out) so the kernel right-multiplies
    w1 = jax.random.uniform(k1, (NUM_INPUTS, HIDDEN), jnp.float32,
                            -bound1, bound1)
    b1 = jax.random.uniform(k2, (HIDDEN,), jnp.float32, -bound1, bound1)
    w2 = jax.random.uniform(k3, (HIDDEN, NUM_OUTPUTS), jnp.float32,
                            -bound2, bound2)
    b2 = jax.random.uniform(k4, (NUM_OUTPUTS,), jnp.float32, -bound2, bound2)
    return w1, b1, w2, b2


if __name__ == "__main__":
    key = jax.random.PRNGKey(0)
    k_params, k_x = jax.random.split(key)
    w1, b1, w2, b2 = init_params(k_params)

    ok = True
    # 8: exact tile; 5: single ragged block; 37: multi-tile + ragged last block
    for batch in (8, 5, 37):
        kx = jax.random.fold_in(k_x, batch)
        x = jax.random.normal(kx, (batch, NUM_INPUTS), jnp.float32)

        out = neural_network_forward(x, w1, b1, w2, b2)
        out = jax.block_until_ready(out)

        # reference check in plain JAX
        ref = jnp.tanh(x @ w1 + b1) @ w2 + b2
        ok = ok and out.shape == (batch, NUM_OUTPUTS)
        ok = ok and bool(jnp.allclose(out, ref, atol=1e-5, rtol=1e-5))

    assert ok
    print("KERNEL_OK")
</pallas_src>

<mosaic_0001>
module attributes {stable_mosaic.version = 11 : i64} {
  func.func @_mlp_kernel(%arg0: i32, %arg1: memref<8x4xf32, #tpu.memory_space<vmem>>, %arg2: memref<4x64xf32, #tpu.memory_space<vmem>>, %arg3: memref<1x64xf32, #tpu.memory_space<vmem>>, %arg4: memref<64x2xf32, #tpu.memory_space<vmem>>, %arg5: memref<1x2xf32, #tpu.memory_space<vmem>>, %arg6: memref<8x2xf32, #tpu.memory_space<vmem>>) attributes {dimension_semantics = [#tpu.dimension_semantics<parallel>], iteration_bounds = array<i64: 1>, scalar_prefetch = 0 : i64, scratch_operands = 0 : i64, tpu.core_type = #tpu.core_type<tc>, window_params = [{transform_indices = @transform_0, window_bounds = array<i64: 8, 4>}, {pipeline_mode = #tpu.pipeline_mode<synchronous>, transform_indices = @transform_1, window_bounds = array<i64: 4, 64>}, {pipeline_mode = #tpu.pipeline_mode<synchronous>, transform_indices = @transform_2, window_bounds = array<i64: 1, 64>}, {pipeline_mode = #tpu.pipeline_mode<synchronous>, transform_indices = @transform_3, window_bounds = array<i64: 64, 2>}, {pipeline_mode = #tpu.pipeline_mode<synchronous>, transform_indices = @transform_4, window_bounds = array<i64: 1, 2>}, {transform_indices = @transform_5, window_bounds = array<i64: 8, 2>}]} {
    %c0 = arith.constant 0 : index
    %c0_0 = arith.constant 0 : index
    %0 = vector.load %arg1[%c0, %c0_0] : memref<8x4xf32, #tpu.memory_space<vmem>>, vector<8x4xf32>
    %c0_1 = arith.constant 0 : index
    %c0_2 = arith.constant 0 : index
    %1 = vector.load %arg2[%c0_1, %c0_2] : memref<4x64xf32, #tpu.memory_space<vmem>>, vector<4x64xf32>
    %2 = vector.extract_strided_slice %0 {offsets = [0, 0], sizes = [8, 1], strides = [1, 1]} : vector<8x4xf32> to vector<8x1xf32>
    %3 = vector.extract_strided_slice %1 {offsets = [0, 0], sizes = [1, 64], strides = [1, 1]} : vector<4x64xf32> to vector<1x64xf32>
    %4 = vector.broadcast %2 : vector<8x1xf32> to vector<8x64xf32>
    %5 = vector.broadcast %3 : vector<1x64xf32> to vector<8x64xf32>
    %6 = arith.mulf %4, %5 : vector<8x64xf32>
    %7 = vector.extract_strided_slice %0 {offsets = [0, 1], sizes = [8, 1], strides = [1, 1]} : vector<8x4xf32> to vector<8x1xf32>
    %8 = vector.extract_strided_slice %1 {offsets = [1, 0], sizes = [1, 64], strides = [1, 1]} : vector<4x64xf32> to vector<1x64xf32>
    %9 = vector.broadcast %7 : vector<8x1xf32> to vector<8x64xf32>
    %10 = vector.broadcast %8 : vector<1x64xf32> to vector<8x64xf32>
    %11 = arith.mulf %9, %10 : vector<8x64xf32>
    %12 = arith.addf %6, %11 : vector<8x64xf32>
    %13 = vector.extract_strided_slice %0 {offsets = [0, 2], sizes = [8, 1], strides = [1, 1]} : vector<8x4xf32> to vector<8x1xf32>
    %14 = vector.extract_strided_slice %1 {offsets = [2, 0], sizes = [1, 64], strides = [1, 1]} : vector<4x64xf32> to vector<1x64xf32>
    %15 = vector.broadcast %13 : vector<8x1xf32> to vector<8x64xf32>
    %16 = vector.broadcast %14 : vector<1x64xf32> to vector<8x64xf32>
    %17 = arith.mulf %15, %16 : vector<8x64xf32>
    %18 = arith.addf %12, %17 : vector<8x64xf32>
    %19 = vector.extract_strided_slice %0 {offsets = [0, 3], sizes = [8, 1], strides = [1, 1]} : vector<8x4xf32> to vector<8x1xf32>
    %20 = vector.extract_strided_slice %1 {offsets = [3, 0], sizes = [1, 64], strides = [1, 1]} : vector<4x64xf32> to vector<1x64xf32>
    %21 = vector.broadcast %19 : vector<8x1xf32> to vector<8x64xf32>
    %22 = vector.broadcast %20 : vector<1x64xf32> to vector<8x64xf32>
    %23 = arith.mulf %21, %22 : vector<8x64xf32>
    %24 = arith.addf %18, %23 : vector<8x64xf32>
    %c0_3 = arith.constant 0 : index
    %c0_4 = arith.constant 0 : index
    %25 = vector.load %arg3[%c0_3, %c0_4] : memref<1x64xf32, #tpu.memory_space<vmem>>, vector<1x64xf32>
    %26 = vector.broadcast %25 : vector<1x64xf32> to vector<8x64xf32>
    %27 = arith.addf %24, %26 : vector<8x64xf32>
    %28 = math.tanh %27 : vector<8x64xf32>
    %c0_5 = arith.constant 0 : index
    %c0_6 = arith.constant 0 : index
    %29 = vector.load %arg4[%c0_5, %c0_6] : memref<64x2xf32, #tpu.memory_space<vmem>>, vector<64x2xf32>
    %cst = arith.constant dense<0.000000e+00> : vector<8x2xf32>
    %30 = tpu.matmul %28, %29, %cst {dimension_numbers = #tpu.dot_dimension_numbers<[1], [0], [0], [1], [0, 0, 1, 1], [], []>} : vector<8x64xf32>, vector<64x2xf32>, vector<8x2xf32> -> vector<8x2xf32>
    %c0_7 = arith.constant 0 : index
    %c0_8 = arith.constant 0 : index
    %31 = vector.load %arg5[%c0_7, %c0_8] : memref<1x2xf32, #tpu.memory_space<vmem>>, vector<1x2xf32>
    %32 = vector.broadcast %31 : vector<1x2xf32> to vector<8x2xf32>
    %33 = arith.addf %30, %32 : vector<8x2xf32>
    %c0_9 = arith.constant 0 : index
    %c0_10 = arith.constant 0 : index
    %34 = vector.load %arg6[%c0_9, %c0_10] : memref<8x2xf32, #tpu.memory_space<vmem>>, vector<8x2xf32>
    tpu.vector_store %arg6[%c0_9, %c0_10], %33 {strides = array<i32>} : memref<8x2xf32, #tpu.memory_space<vmem>>, vector<8x2xf32>,
    return
  }
  func.func @transform_0(%arg0: i32) -> (i32, i32) {
    %c0_i32 = arith.constant 0 : i32
    %c0_i32_0 = arith.constant 0 : i32
    return %arg0, %c0_i32 : i32, i32
  }
  func.func @transform_1(%arg0: i32) -> (i32, i32) {
    %c0_i32 = arith.constant 0 : i32
    %c0_i32_0 = arith.constant 0 : i32
    %c0_i32_1 = arith.constant 0 : i32
    return %c0_i32, %c0_i32_0 : i32, i32
  }
  func.func @transform_2(%arg0: i32) -> (i32, i32) {
    %c0_i32 = arith.constant 0 : i32
    %c0_i32_0 = arith.constant 0 : i32
    %c0_i32_1 = arith.constant 0 : i32
    return %c0_i32, %c0_i32_0 : i32, i32
  }
  func.func @transform_3(%arg0: i32) -> (i32, i32) {
    %c0_i32 = arith.constant 0 : i32
    %c0_i32_0 = arith.constant 0 : i32
    %c0_i32_1 = arith.constant 0 : i32
    return %c0_i32, %c0_i32_0 : i32, i32
  }
  func.func @transform_4(%arg0: i32) -> (i32, i32) {
    %c0_i32 = arith.constant 0 : i32
    %c0_i32_0 = arith.constant 0 : i32
    %c0_i32_1 = arith.constant 0 : i32
    return %c0_i32, %c0_i32_0 : i32, i32
  }
  func.func @transform_5(%arg0: i32) -> (i32, i32) {
    %c0_i32 = arith.constant 0 : i32
    %c0_i32_0 = arith.constant 0 : i32
    return %arg0, %c0_i32 : i32, i32
  }
}

</mosaic_0001>

<bundles_post_ra>
// kernel: tpu_custom_call.1
= control target key start
LH: loop header
LB: loop body
LE: loop exit
PB: predicated region body
PF: predicated region fallthrough
CT: control target
= control target key end

     0   :  { %v223_v0 = vmov 0   ;;  %v224_v2 = vmov 2   ;;  %v225_v3 = vmov 1   ;;  %v226_v4 = vmov 3   ;;  %s299_s0 = inlined_call_operand.vmem [shape: f32[8,4], index: 0, kind: input, shape index: {}]   ;;  %s300_s3 = inlined_call_operand.vmem [shape: f32[64,2], index: 3, kind: input, shape index: {}]   ;;  %s301_s1 = inlined_call_operand.vmem [shape: f32[4,64], index: 1, kind: input, shape index: {}]   ;;  %s302_s2 = inlined_call_operand.vmem [shape: f32[1,64], index: 2, kind: input, shape index: {}]   ;;  %s303_s4 = inlined_call_operand.vmem [shape: f32[1,2], index: 4, kind: input, shape index: {}]   ;;  %s304_s5 = inlined_call_operand.vmem [shape: f32[8,2], index: 5, kind: output, shape index: {}]  }
   0x1   :  { %216 = vset.pattern.permute.xlu0 %v223_v0  ;;  %v20_v1 = vld [vmem:[%s299_s0] sm:$0xff]  ;;  %218 = vset.pattern.permute.xlu1 %v224_v2  ;;  %v72_v6 = vld [vmem:[%s300_s3 + $0x8] sm:$0xff]  ;;  %v227_v8 = vmov 0.0|0.0   ;;  %v73_v9 = vld [vmem:[%s300_s3 + $0x10] sm:$0xff]  ;;  %vm228_vm0 = vmmov 0   ;;  %v229_v17 = vmov 0.0   ;;  %v27_v19 = vlaneseq }
   0x2   :  { %24 = vperm.xlu0 %216, %v20_v1   ;;  %43 = vperm.xlu1 %218, %v20_v1   ;;  %v71_v5 = vld [vmem:[%s300_s3] sm:$0xff]  ;;  %v74_v10 = vld [vmem:[%s300_s3 + $0x18] sm:$0xff]  ;;  %v76_v13 = vld [vmem:[%s300_s3 + $0x28] sm:$0xff]  ;;  %vm86_vm1 = vcmask 523264   ;;  %vm160_vm2 = vcmask 15360  }
   0x3   :  { %v198_v7 = vpack.c.bf16 %v72_v6, %v71_v5  ;;  %197 = vmatprep.subr.bf16.mxu0 %v227_v8  ;;  %v201_v11 = vpack.c.bf16 %v74_v10, %v73_v9  ;;  %v75_v12 = vld [vmem:[%s300_s3 + $0x20] sm:$0xff]  ;;  %v77_v15 = vld [vmem:[%s300_s3 + $0x30] sm:$0xff]  ;;  %v78_v16 = vld [vmem:[%s300_s3 + $0x38] sm:$0xff]  ;;  %194 = vmatprep.mubr.msk.f32.mxu0 %vm228_vm0, %v229_v17  ;;  %v28_v20 = vshrl.u32 %v27_v19, 7 }
   0x4   :  { %v204_v14 = vpack.c.bf16 %v76_v13, %v75_v12  ;;  %v207_v18 = vpack.c.bf16 %v78_v16, %v77_v15  ;;  %v21_v23 = vld [vmem:[%s301_s1] sm:$0xf] }
   0x5   :  { %199 = vmatpush3.bf16.msra.mxu0 %v198_v7  ;;  %v29_v21 = vsub.s32 0, %v28_v20  ;;  %v38_v22 = vsub.s32 1, %v28_v20  ;;  %v48_v25 = vsub.s32 2, %v28_v20  ;;  %v58_v27 = vsub.s32 3, %v28_v20  ;;  %v166_v40 = vld [vmem:[%s302_s2] ss:$0 sm:$0xff] }
   0x6   :  { %217 = vset.pattern.permute.xlu0 %v225_v3  ;;  %219 = vset.pattern.permute.xlu1 %v226_v4  ;;  %v167_v44 = vld [vmem:[%s303_s4] ss:$0 sm:$0xff] }
   0x7   :  { %33 = vperm.xlu0 %217, %v20_v1   ;;  %53 = vperm.xlu1 %219, %v20_v1   ;;  %v30_v28 = vrot.slane %v21_v23, %v29_v21  ;;  %v39_v29 = vrot.slane %v21_v23, %v38_v22  ;;  %v49_v30 = vrot.slane %v21_v23, %v48_v25 }
   0x8   :  { %200 = vmatprep.subr.bf16.mxu0 %v227_v8  ;;  %v59_v31 = vrot.slane %v21_v23, %v58_v27 }
   0x9   :  { %202 = vmatpush3.bf16.msra.mxu0 %v201_v11 }
   0xa   :  { %203 = vmatprep.subr.bf16.mxu0 %v227_v8 }
   0xb   :  { %220 = vset.pattern.permute.xlu0 %v226_v4 }
   0xd   :  { %205 = vmatpush3.bf16.msra.mxu0 %v204_v14 }
   0xe   :  { %206 = vmatprep.subr.bf16.mxu0 %v227_v8 }
  0x11   :  { %208 = vmatpush3.bf16.msra.mxu0 %v207_v18 }
  0x81   :  { %v25_v24 = vpop.permute.xlu0 %24  ;;  %v44_v26 = vpop.permute.xlu1 %43 }
  0x82   :  { %v31_v34 = vmul.f32 %v30_v28, %v25_v24  ;;  %v50_v36 = vmul.f32 %v49_v30, %v44_v26 }
  0x86   :  { %v34_v32 = vpop.permute.xlu0 %33  ;;  %v54_v33 = vpop.permute.xlu1 %53 }
  0x87   :  { %v40_v35 = vmul.f32 %v39_v29, %v34_v32  ;;  %v60_v38 = vmul.f32 %v59_v31, %v54_v33 }
  0x89   :  { %v41_v37 = vadd.f32 %v40_v35, %v31_v34 }
  0x8b   :  { %v51_v39 = vadd.f32 %v50_v36, %v41_v37 }
  0x8d   :  { %v61_v41 = vadd.f32 %v60_v38, %v51_v39 }
  0x8f   :  { %v69_v42 = vadd.f32 %v166_v40, %v61_v41 }
  0x91   :  { %221 = vtanh.f32 %v69_v42 }
  0x9b   :  { %v222_v43 = vpop.eup %221 }
  0x9c   :  { %195 = vmatmul.mubr.msk.f32.vlgmr.msra.gmra.mrb[0].mxu0 %vm86_vm1, %v222_v43 }
 0x16f   :  { %v156_v45 = vpop.f32.mrb[0].mxu0 }
 0x170   :  { %v157_v46 = vadd.f32 %v167_v44, %v156_v45  ;;  %v196_v47 = vpop.f32.mrb[1].mxu0 }
 0x172   :  { %161 = vst.msk [vmem:[%s304_s5] sm:$0xff] %vm160_vm2, %v157_v46 }

</bundles_post_ra>
